<compile_context>
chip_gen: v7x
topology: tpu7x:2x2x1
jax: 0.10.0
libtpu: 0.0.40
codegen_flags: <defaults>
</compile_context>

<pallas_src>
import functools
import math

import jax
import jax.numpy as jnp
from jax import lax
from jax.experimental import pallas as pl
from jax.experimental.pallas import tpu as pltpu

_LANES = 128
_SUBLANES = 8


def _round_up(x, m):
    return (x + m - 1) // m * m


def _sublane_multiple(dtype):
    # f32 -> 8, bf16/f16 -> 16, int8/uint8/bool -> 32 (packed-sublane tiling).
    return max(_SUBLANES, 32 // jnp.dtype(dtype).itemsize)


def _dice_bce_kernel(x_ref, t_ref, out_ref, *, num_r, tail_rows, approx):
    """Grid (N, num_r).  Blocks: x/t (1, TR, 128); out (1, 4, 8, 128), resident
    across the r axis and used directly as the accumulator."""
    r = pl.program_id(1)

    @pl.when(r == 0)
    def _():
        out_ref[...] = jnp.zeros_like(out_ref)

    x = x_ref[0].astype(jnp.float32)            # (TR, 128)
    t = t_ref[0].astype(jnp.float32)            # (TR, 128)
    tr = x.shape[0]

    # One exp per element feeds both the stable BCE log-term and the stable
    # sigmoid (the EUP has a single VLIW slot).
    e = jnp.exp(-jnp.abs(x))
    bce = jnp.maximum(x, 0.0) - x * t + jnp.log1p(e)
    num = jnp.where(x >= 0.0, 1.0, e)
    den = 1.0 + e
    if approx:
        probs = num * pl.reciprocal(den, approx=True)   # EUP-only; v7x micro-opt
    else:
        probs = num / den                                # exact sigmoid(x)

    def fold(a):
        # (TR, 128) -> (8, 128): tile-aligned reshape + pure-VPU vreg adds.
        return jnp.sum(a.reshape(tr // _SUBLANES, _SUBLANES, _LANES), axis=0)

    def accum(bce_v, probs_v, t_v):
        out_ref[0, 0, :, :] += fold(bce_v)
        out_ref[0, 1, :, :] += fold(probs_v * t_v)
        out_ref[0, 2, :, :] += fold(probs_v)
        out_ref[0, 3, :, :] += fold(t_v)

    if tail_rows == tr:
        # R is a multiple of TR: every block is full, no masking anywhere.
        accum(bce, probs, t)
    else:
        # Ragged last chunk: rows >= tail_rows of the final block overhang the
        # array (undefined on read) and must contribute exactly zero.
        @pl.when(r < num_r - 1)
        def _():
            accum(bce, probs, t)

        @pl.when(r == num_r - 1)
        def _():
            row = lax.broadcasted_iota(jnp.int32, (tr, _LANES), 0)
            m = row < tail_rows
            zero = jnp.float32(0.0)
            accum(jnp.where(m, bce, zero),
                  jnp.where(m, probs, zero),
                  jnp.where(m, t, zero))


def dice_bce_loss(logits, targets, smooth=1e-6, *, block_rows=8192,
                  approx_reciprocal=False):
    """Forward pass of DiceBCELoss for NCHW logits/targets.  Returns scalar f32.

    Inputs are consumed in their native dtypes (e.g. bf16 logits, int8 0/1 target
    masks) and upcast to f32 inside the kernel — no wrapper-side casting.
    """
    assert logits.shape == targets.shape
    N = logits.shape[0]
    D = math.prod(logits.shape[1:])
    R = pl.cdiv(D, _LANES)                       # 128-lane rows per sample

    x = logits.reshape(N, D)
    t = targets.reshape(N, D)
    if D != R * _LANES:
        # Lane-tail pad only (< 128 elems/sample) so the (N, R, 128) reshape is
        # valid.  Pad values contribute exactly 0 to every partial sum
        # (sigmoid(-1e9) == 0, every BCE term == 0, target == 0).
        # TODO(synk): a manual-DMA path could avoid this copy when D % 128 != 0.
        pad = R * _LANES - D
        x = jnp.pad(x, ((0, 0), (0, pad)), constant_values=-1e9)
        t = jnp.pad(t, ((0, 0), (0, pad)), constant_values=0)
    x = x.reshape(N, R, _LANES)
    t = t.reshape(N, R, _LANES)

    # Balanced R-chunks, rounded to the packed-sublane multiple of the narrowest
    # input dtype; R itself is never rounded up (ragged tail masked in-kernel).
    sub = max(_sublane_multiple(x.dtype), _sublane_multiple(t.dtype))
    n_chunks = max(1, pl.cdiv(R, block_rows))
    tr = _round_up(pl.cdiv(R, n_chunks), sub)

    # Keep the 2-deep input pipeline under ~24 MiB so the same tiling fits the
    # VMEM limits on v5e/v6e (128 MiB phys) *and* v7x (64 MiB phys).
    bytes_per_row = _LANES * (jnp.dtype(x.dtype).itemsize
                              + jnp.dtype(t.dtype).itemsize)
    tr_cap = max(sub, (24 << 20) // (2 * bytes_per_row) // sub * sub)
    tr = min(tr, tr_cap)

    num_r = pl.cdiv(R, tr)
    tail_rows = R - (num_r - 1) * tr             # valid rows in the last chunk

    # 2 inputs x 2 buffers x block + double-buffered output block + headroom.
    pipeline_bytes = 2 * tr * bytes_per_row + 2 * 4 * _SUBLANES * _LANES * 4
    vmem_limit = int(min(max(pipeline_bytes + (4 << 20), 16 << 20), 28 << 20))

    kernel = functools.partial(_dice_bce_kernel, num_r=num_r,
                               tail_rows=tail_rows, approx=approx_reciprocal)

    partials = pl.pallas_call(
        kernel,
        out_shape=jax.ShapeDtypeStruct((N, 4, _SUBLANES, _LANES), jnp.float32),
        grid_spec=pltpu.PrefetchScalarGridSpec(
            num_scalar_prefetch=0,
            grid=(N, num_r),
            in_specs=[
                pl.BlockSpec((1, tr, _LANES), lambda b, r: (b, r, 0)),
                pl.BlockSpec((1, tr, _LANES), lambda b, r: (b, r, 0)),
            ],
            out_specs=pl.BlockSpec((1, 4, _SUBLANES, _LANES),
                                   lambda b, r: (b, 0, 0, 0)),
        ),
        compiler_params=pltpu.CompilerParams(
            dimension_semantics=("parallel", "arbitrary"),
            vmem_limit_bytes=vmem_limit,
        ),
    )(x, t)

    # Tiny final combine in XLA: (N, 4, 8, 128) -> (N, 4) -> scalar.
    sums = jnp.sum(partials, axis=(2, 3))
    bce_sum, inter, prob_sum, tgt_sum = (sums[:, i] for i in range(4))
    bce = jnp.sum(bce_sum) / (N * D)             # mean over the real elements
    union = prob_sum + tgt_sum
    dice = jnp.mean(1.0 - (2.0 * inter + smooth) / (union + smooth))
    return (bce + dice).astype(jnp.float32)


def _reference(logits, targets, smooth=1e-6):
    x = logits.astype(jnp.float32)
    t = targets.astype(jnp.float32)
    bce = jnp.mean(jnp.maximum(x, 0.0) - x * t + jnp.log1p(jnp.exp(-jnp.abs(x))))
    p = jax.nn.sigmoid(x)
    inter = jnp.sum(p * t, axis=(1, 2, 3))
    union = jnp.sum(p, axis=(1, 2, 3)) + jnp.sum(t, axis=(1, 2, 3))
    dice = jnp.mean(1.0 - (2.0 * inter + smooth) / (union + smooth))
    return bce + dice


if __name__ == "__main__":
    key = jax.random.PRNGKey(0)
    k1, k2 = jax.random.split(key)
    N, C, H, W = 2, 4, 16, 16
    logits = jax.random.normal(k1, (N, C, H, W), dtype=jnp.float32)
    targets = (jax.random.uniform(k2, (N, C, H, W)) > 0.5).astype(jnp.float32)

    loss = jax.block_until_ready(dice_bce_loss(logits, targets))
    ref = jax.block_until_ready(_reference(logits, targets))
    assert jnp.allclose(loss, ref, atol=1e-5, rtol=1e-5), (loss, ref)
    print("KERNEL_OK")
</pallas_src>

<mosaic_0001>
module attributes {stable_mosaic.version = 11 : i64} {
  func.func @_dice_bce_kernel(%arg0: i32, %arg1: i32, %arg2: memref<1x8x128xf32, #tpu.memory_space<vmem>>, %arg3: memref<1x8x128xf32, #tpu.memory_space<vmem>>, %arg4: memref<1x4x8x128xf32, #tpu.memory_space<vmem>>) attributes {dimension_semantics = [#tpu.dimension_semantics<parallel>, #tpu.dimension_semantics<arbitrary>], iteration_bounds = array<i64: 2, 1>, scalar_prefetch = 0 : i64, scratch_operands = 0 : i64, tpu.core_type = #tpu.core_type<tc>, window_params = [{transform_indices = @transform_0, window_bounds = array<i64: 1, 8, 128>}, {transform_indices = @transform_1, window_bounds = array<i64: 1, 8, 128>}, {transform_indices = @transform_2, window_bounds = array<i64: 1, 4, 8, 128>}]} {
    %c0_i32 = arith.constant 0 : i32
    %0 = arith.cmpi eq, %arg1, %c0_i32 : i32
    %1 = arith.extui %0 : i1 to i32
    %c0_i32_0 = arith.constant 0 : i32
    %2 = arith.cmpi ne, %1, %c0_i32_0 : i32
    scf.if %2 {
      %cst_43 = arith.constant 0.000000e+00 : f32
      %57 = vector.broadcast %cst_43 : f32 to vector<1x4x8x128xf32>
      %c0_44 = arith.constant 0 : index
      %c0_45 = arith.constant 0 : index
      %c0_46 = arith.constant 0 : index
      %c0_47 = arith.constant 0 : index
      %58 = vector.load %arg4[%c0_44, %c0_45, %c0_46, %c0_47] : memref<1x4x8x128xf32, #tpu.memory_space<vmem>>, vector<1x4x8x128xf32>
      tpu.vector_store %arg4[%c0_44, %c0_45, %c0_46, %c0_47], %57 {strides = array<i32>} : memref<1x4x8x128xf32, #tpu.memory_space<vmem>>, vector<1x4x8x128xf32>,
    } else {
    }
    %c0 = arith.constant 0 : index
    %c0_1 = arith.constant 0 : index
    %c0_2 = arith.constant 0 : index
    %3 = vector.load %arg2[%c0, %c0_1, %c0_2] : memref<1x8x128xf32, #tpu.memory_space<vmem>>, vector<1x8x128xf32>
    %4 = vector.shape_cast %3 : vector<1x8x128xf32> to vector<8x128xf32>
    %c0_3 = arith.constant 0 : index
    %c0_4 = arith.constant 0 : index
    %c0_5 = arith.constant 0 : index
    %5 = vector.load %arg3[%c0_3, %c0_4, %c0_5] : memref<1x8x128xf32, #tpu.memory_space<vmem>>, vector<1x8x128xf32>
    %6 = vector.shape_cast %5 : vector<1x8x128xf32> to vector<8x128xf32>
    %7 = math.absf %4 : vector<8x128xf32>
    %cst = arith.constant 0.000000e+00 : f32
    %8 = vector.broadcast %cst : f32 to vector<8x128xf32>
    %9 = arith.subf %8, %7 : vector<8x128xf32>
    %10 = math.exp %9 : vector<8x128xf32>
    %cst_6 = arith.constant 0.000000e+00 : f32
    %11 = vector.broadcast %cst_6 : f32 to vector<8x128xf32>
    %12 = arith.maximumf %4, %11 : vector<8x128xf32>
    %13 = arith.mulf %4, %6 : vector<8x128xf32>
    %14 = arith.subf %12, %13 : vector<8x128xf32>
    %15 = math.log1p %10 : vector<8x128xf32>
    %16 = arith.addf %14, %15 : vector<8x128xf32>
    %cst_7 = arith.constant 0.000000e+00 : f32
    %17 = vector.broadcast %cst_7 : f32 to vector<8x128xf32>
    %18 = arith.cmpf oge, %4, %17 : vector<8x128xf32>
    %cst_8 = arith.constant 1.000000e+00 : f32
    %19 = vector.broadcast %cst_8 : f32 to vector<8x128xf32>
    %20 = arith.select %18, %19, %10 : vector<8x128xi1>, vector<8x128xf32>
    %cst_9 = arith.constant 1.000000e+00 : f32
    %21 = vector.broadcast %cst_9 : f32 to vector<8x128xf32>
    %22 = arith.addf %21, %10 : vector<8x128xf32>
    %23 = arith.divf %20, %22 : vector<8x128xf32>
    %c0_10 = arith.constant 0 : index
    %c0_11 = arith.constant 0 : index
    %c0_12 = arith.constant 0 : index
    %c0_13 = arith.constant 0 : index
    %24 = vector.load %arg4[%c0_10, %c0_11, %c0_12, %c0_13] : memref<1x4x8x128xf32, #tpu.memory_space<vmem>>, vector<1x1x8x128xf32>
    %25 = vector.shape_cast %24 : vector<1x1x8x128xf32> to vector<8x128xf32>
    %26 = vector.shape_cast %16 : vector<8x128xf32> to vector<1x8x128xf32>
    %cst_14 = arith.constant dense<0.000000e+00> : vector<8x128xf32>
    %27 = vector.multi_reduction <add>, %26, %cst_14 [0] : vector<1x8x128xf32> to vector<8x128xf32>
    %28 = arith.addf %25, %27 : vector<8x128xf32>
    %c0_15 = arith.constant 0 : index
    %c0_16 = arith.constant 0 : index
    %c0_17 = arith.constant 0 : index
    %c0_18 = arith.constant 0 : index
    %29 = vector.load %arg4[%c0_15, %c0_16, %c0_17, %c0_18] : memref<1x4x8x128xf32, #tpu.memory_space<vmem>>, vector<1x1x8x128xf32>
    %30 = vector.shape_cast %29 : vector<1x1x8x128xf32> to vector<8x128xf32>
    %31 = vector.shape_cast %28 : vector<8x128xf32> to vector<1x1x8x128xf32>
    tpu.vector_store %arg4[%c0_15, %c0_16, %c0_17, %c0_18], %31 {strides = array<i32>} : memref<1x4x8x128xf32, #tpu.memory_space<vmem>>, vector<1x1x8x128xf32>,
    %c0_19 = arith.constant 0 : index
    %c1 = arith.constant 1 : index
    %c0_20 = arith.constant 0 : index
    %c0_21 = arith.constant 0 : index
    %32 = vector.load %arg4[%c0_19, %c1, %c0_20, %c0_21] : memref<1x4x8x128xf32, #tpu.memory_space<vmem>>, vector<1x1x8x128xf32>
    %33 = vector.shape_cast %32 : vector<1x1x8x128xf32> to vector<8x128xf32>
    %34 = arith.mulf %23, %6 : vector<8x128xf32>
    %35 = vector.shape_cast %34 : vector<8x128xf32> to vector<1x8x128xf32>
    %cst_22 = arith.constant dense<0.000000e+00> : vector<8x128xf32>
    %36 = vector.multi_reduction <add>, %35, %cst_22 [0] : vector<1x8x128xf32> to vector<8x128xf32>
    %37 = arith.addf %33, %36 : vector<8x128xf32>
    %c0_23 = arith.constant 0 : index
    %c1_24 = arith.constant 1 : index
    %c0_25 = arith.constant 0 : index
    %c0_26 = arith.constant 0 : index
    %38 = vector.load %arg4[%c0_23, %c1_24, %c0_25, %c0_26] : memref<1x4x8x128xf32, #tpu.memory_space<vmem>>, vector<1x1x8x128xf32>
    %39 = vector.shape_cast %38 : vector<1x1x8x128xf32> to vector<8x128xf32>
    %40 = vector.shape_cast %37 : vector<8x128xf32> to vector<1x1x8x128xf32>
    tpu.vector_store %arg4[%c0_23, %c1_24, %c0_25, %c0_26], %40 {strides = array<i32>} : memref<1x4x8x128xf32, #tpu.memory_space<vmem>>, vector<1x1x8x128xf32>,
    %c0_27 = arith.constant 0 : index
    %c2 = arith.constant 2 : index
    %c0_28 = arith.constant 0 : index
    %c0_29 = arith.constant 0 : index
    %41 = vector.load %arg4[%c0_27, %c2, %c0_28, %c0_29] : memref<1x4x8x128xf32, #tpu.memory_space<vmem>>, vector<1x1x8x128xf32>
    %42 = vector.shape_cast %41 : vector<1x1x8x128xf32> to vector<8x128xf32>
    %43 = vector.shape_cast %23 : vector<8x128xf32> to vector<1x8x128xf32>
    %cst_30 = arith.constant dense<0.000000e+00> : vector<8x128xf32>
    %44 = vector.multi_reduction <add>, %43, %cst_30 [0] : vector<1x8x128xf32> to vector<8x128xf32>
    %45 = arith.addf %42, %44 : vector<8x128xf32>
    %c0_31 = arith.constant 0 : index
    %c2_32 = arith.constant 2 : index
    %c0_33 = arith.constant 0 : index
    %c0_34 = arith.constant 0 : index
    %46 = vector.load %arg4[%c0_31, %c2_32, %c0_33, %c0_34] : memref<1x4x8x128xf32, #tpu.memory_space<vmem>>, vector<1x1x8x128xf32>
    %47 = vector.shape_cast %46 : vector<1x1x8x128xf32> to vector<8x128xf32>
    %48 = vector.shape_cast %45 : vector<8x128xf32> to vector<1x1x8x128xf32>
    tpu.vector_store %arg4[%c0_31, %c2_32, %c0_33, %c0_34], %48 {strides = array<i32>} : memref<1x4x8x128xf32, #tpu.memory_space<vmem>>, vector<1x1x8x128xf32>,
    %c0_35 = arith.constant 0 : index
    %c3 = arith.constant 3 : index
    %c0_36 = arith.constant 0 : index
    %c0_37 = arith.constant 0 : index
    %49 = vector.load %arg4[%c0_35, %c3, %c0_36, %c0_37] : memref<1x4x8x128xf32, #tpu.memory_space<vmem>>, vector<1x1x8x128xf32>
    %50 = vector.shape_cast %49 : vector<1x1x8x128xf32> to vector<8x128xf32>
    %51 = vector.shape_cast %6 : vector<8x128xf32> to vector<1x8x128xf32>
    %cst_38 = arith.constant dense<0.000000e+00> : vector<8x128xf32>
    %52 = vector.multi_reduction <add>, %51, %cst_38 [0] : vector<1x8x128xf32> to vector<8x128xf32>
    %53 = arith.addf %50, %52 : vector<8x128xf32>
    %c0_39 = arith.constant 0 : index
    %c3_40 = arith.constant 3 : index
    %c0_41 = arith.constant 0 : index
    %c0_42 = arith.constant 0 : index
    %54 = vector.load %arg4[%c0_39, %c3_40, %c0_41, %c0_42] : memref<1x4x8x128xf32, #tpu.memory_space<vmem>>, vector<1x1x8x128xf32>
    %55 = vector.shape_cast %54 : vector<1x1x8x128xf32> to vector<8x128xf32>
    %56 = vector.shape_cast %53 : vector<8x128xf32> to vector<1x1x8x128xf32>
    tpu.vector_store %arg4[%c0_39, %c3_40, %c0_41, %c0_42], %56 {strides = array<i32>} : memref<1x4x8x128xf32, #tpu.memory_space<vmem>>, vector<1x1x8x128xf32>,
    return
  }
  func.func @transform_0(%arg0: i32, %arg1: i32) -> (i32, i32, i32) {
    %c0_i32 = arith.constant 0 : i32
    %c0_i32_0 = arith.constant 0 : i32
    return %arg0, %arg1, %c0_i32 : i32, i32, i32
  }
  func.func @transform_1(%arg0: i32, %arg1: i32) -> (i32, i32, i32) {
    %c0_i32 = arith.constant 0 : i32
    %c0_i32_0 = arith.constant 0 : i32
    return %arg0, %arg1, %c0_i32 : i32, i32, i32
  }
  func.func @transform_2(%arg0: i32, %arg1: i32) -> (i32, i32, i32, i32) {
    %c0_i32 = arith.constant 0 : i32
    %c0_i32_0 = arith.constant 0 : i32
    %c0_i32_1 = arith.constant 0 : i32
    %c0_i32_2 = arith.constant 0 : i32
    return %arg0, %c0_i32, %c0_i32_0, %c0_i32_1 : i32, i32, i32, i32
  }
}

</mosaic_0001>

<bundles_post_ra>
// kernel: tpu_custom_call.1
= control target key start
LH: loop header
LB: loop body
LE: loop exit
PB: predicated region body
PF: predicated region fallthrough
CT: control target
= control target key end

     0   :  { %7 = vsyncpa [#allocation3], 0  ;;  %s884_s0 = inlined_call_operand.hbm [shape: f32[2,8,128], index: 0, kind: input, shape index: {}]   ;;  %s885_s1 = inlined_call_operand.hbm [shape: f32[2,8,128], index: 1, kind: input, shape index: {}]   ;;  %s886_s2 = inlined_call_operand.hbm [shape: f32[2,4,8,128], index: 2, kind: output, shape index: {}]  }
   0x1   :  { %9 = vsyncpa [#allocation3 + $0x1], 0 }
   0x2   :  { %10 = vsyncpa [#allocation6], 0 }
   0x3   :  { %12 = vsyncpa [#allocation6 + $0x1], 0 }
   0x4   :  { %13 = vsyncpa [#allocation4], 0 }
   0x5   :  { %15 = vsyncpa [#allocation4 + $0x1], 0  ;;  %s654_s9 = smov 0   ;;  %s656_s10 = smov 0  }
   0x6   :  { %s658_s11 = smov 0   ;;  %s660_s12 = smov 0  }
   0x7   :  { %s662_s13 = smov 0   ;;  %s664_s14 = smov 0  }
   0x8 LB: > { %s386_s15 = sadd.s32 4294967295, %s632_s14   ;;  %s387_s16 = sadd.s32 4294967294, %s632_s14   ;;  %s632_s14 = sphi %s664_s14, %s21_s14   ;;  %s628_s13 = sphi %s662_s13, %s906_s13   ;;  %s624_s12 = sphi %s660_s12, %s905_s12   ;;  %s620_s11 = sphi %s658_s11, %s904_s11   ;;  %s616_s10 = sphi %s656_s10, %s903_s10   ;;  %s612_s9 = sphi %s654_s9, %s902_s9  }
   0x9   : > { %s33_s17 = sadd.s32 1, %s628_s13  ;;  %s42_s18 = sadd.s32 1, %s620_s11 }
   0xa   : > { %p35_p0 = scmp.ge.s32.totalorder %s33_s17, 2  ;;  %p49_p1 = scmp.ne.s32.totalorder %s620_s11, %s616_s10 }
   0xb   : > { %p50_p2 = scmp.eq.s32.totalorder %s632_s14, 0  ;;  %p55_p3 = scmp.ne.s32.totalorder %s616_s10, %s612_s9 }
   0xc   : > { %s908_s17 = smov (%p35_p0, %s33_s17), 0  ;;  %p56_p5 = scmp.eq.s32.totalorder %s386_s15, 0 }
   0xd   : > { %p695_p4 = por %p50_p2, %p49_p1  ;;  %s37_s20 = ssub.s32 %s628_s13, %s908_s17 }
   0xe   : > { %p107_p6 = scmp.eq.s32.totalorder %s386_s15, 1  ;;  %p40_p7 = scmp.eq.s32.totalorder %s37_s20, 0 }
   0xf   : > { %p701_p8 = por %p56_p5, %p55_p3  ;;  %p113_p10 = scmp.eq.s32.totalorder %s387_s16, 1 }
  0x10   : > { %p705_p9 = por %p107_p6, %p49_p1  ;;  %p427_p13 = scmp.lt.s32.totalorder %s632_s14, 2 }
  0x11   : > { %s890_s21 = scalar_select %p701_p8, 1, 0 }
  0x12   : > { %s891_s22 = scalar_select %p705_p9, 1, 0 }
  0x13   : > { %s710_s23 = scalar_select %p40_p7, %s620_s11, %s42_s18  }
  0x14   : > { %p712_p11 = por %p113_p10, %p55_p3  ;;  %s719_s25 = sand.u32 1, %s620_s11  }
  0x15   : > { %s390_s26 = sshll.u32 %s719_s25, 3  ;;  %s391_s27 = sshll.u32 %s628_s13, 7 }
  0x16   : > { %s892_s24 = scalar_select %p712_p11, 1, 0 }
  0x17   : > { %s728_s30 = scalar_lea.hbm %s884_s0, %s391_s27  ;;  %s137_s3 = scalar_lea.vmem [#allocation2], %s390_s26 }
  0x18   : > { %s145_s4 = sshll.u32 %s137_s3, 4  ;;  %p736_p0 = pnand %p427_p13, %p695_p4  ;;  %s732_s4 = int_to_ptr.vmem [resolvable:$true] %s145_s4 }
  0x19   : > { %s134_s6 = scalar_lea.sflag [#allocation3], %s719_s25  ;;  %s486_s7 = scalar_lea.hbm %s728_s30, 128 }
  0x1a   : > { %p487_p3 = scmp.ne.s32.totalorder %s728_s30, %s486_s7  ;;  %p488_p5 = pneg %p736_p0 }
  0x1b   : > { %s491_s16 = scalar_lea.hbm %s884_s0, 256  ;;  %p492_p4 = scmp.lt.u32.totalorder %s728_s30, %s884_s0 }
  0x1c   : > { %p489_p6 = pnand %p488_p5, %p487_p3  ;;  %p493_p10 = scmp.lt.u32.totalorder %s491_s16, %s486_s7 }
  0x1d   : > { %p495_p12 = scmp.lt.u32.totalorder %s486_s7, %s728_s30 }
  0x1e   : > { %p490_p7 = pneg %p489_p6  ;;  %p494_p13 = por %p493_p10, %p492_p4 }
  0x20   : > { %p496_p1 = por %p495_p12, %p494_p13 }
  0x22   : > { %p497_p2 = pnand %p496_p1, %p490_p7 }
  0x24   : > { %500 = shalt.err (!%p497_p2)
}
  0x25   : > { %s501_s20 = scalar_lea.vmem %s732_s4, 128  ;;  %s634_s28 = smov [#allocation2]  }
  0x26   : > { %p502_p3 = scmp.ne.s32.totalorder %s732_s4, %s501_s20  ;;  %s506_s29 = sshll.u32 %s634_s28, 4  ;;  %s507_s29 = int_to_ptr.vmem [resolvable:$false] %s506_s29 }
  0x27   : > { %s508_s3 = scalar_lea.vmem %s507_s29, 256  ;;  %p509_p9 = scmp.lt.s32.totalorder %s732_s4, %s507_s29 }
  0x28   : > { %p504_p6 = pnand %p502_p3, %p488_p5  ;;  %p510_p4 = scmp.lt.s32.totalorder %s508_s3, %s501_s20 }
  0x2a   : > { %p505_p11 = pneg %p504_p6  ;;  %p511_p10 = por %p510_p4, %p509_p9 }
  0x2c   : > { %p512_p12 = pnand %p511_p10, %p505_p11 }
  0x2e   : > { %515 = shalt.err (!%p512_p12)
}
  0x2f   : > { %419 = dma.hbm_to_vmem [thread:$0]  (!%p736_p0), %s728_s30, 128, %s732_s4, %s134_s6  }
  0x30   : > { %p894_p1 = scmp.lt.s32.totalorder %s632_s14, 3  ;;  %p895_p2 = scmp.ge.s32.totalorder %s632_s14, 1 }
  0x31   : > { %s781_s16 = scalar_lea.hbm %s885_s1, %s391_s27  ;;  %s156_s18 = scalar_lea.vmem [#allocation5], %s390_s26 }
  0x32   : > { %p772_p7 = pnand %p895_p2, %p894_p1  ;;  %s164_s19 = sshll.u32 %s156_s18, 4  ;;  %s165_s19 = int_to_ptr.vmem [resolvable:$true] %s164_s19 }
  0x33   : > { %s153_s30 = scalar_lea.sflag [#allocation6], %s719_s25  ;;  %s516_s4 = scalar_lea.hbm %s781_s16, 128 }
  0x34   : > { %s896_s7 = scalar_select %p772_p7, 1, 0 }
  0x35   : > { %p517_p9 = scmp.ne.s32.totalorder %s781_s16, %s516_s4  ;;  %s521_s27 = scalar_lea.hbm %s885_s1, 256 }
  0x36   : > { %p522_p3 = scmp.lt.u32.totalorder %s781_s16, %s885_s1  ;;  %p523_p6 = scmp.lt.u32.totalorder %s521_s27, %s516_s4 }
  0x37   : > { %p519_p11 = pnand %p517_p9, %p488_p5  ;;  %p525_p10 = scmp.lt.u32.totalorder %s516_s4, %s781_s16 }
  0x38   : > { %p524_p4 = por %p523_p6, %p522_p3 }
  0x39   : > { %p520_p13 = pneg %p519_p11 }
  0x3a   : > { %p526_p12 = por %p525_p10, %p524_p4 }
  0x3c   : > { %p527_p1 = pnand %p526_p12, %p520_p13 }
  0x3e   : > { %530 = shalt.err (!%p527_p1)
}
  0x3f   : > { %s531_s25 = scalar_lea.vmem %s165_s19, 128  ;;  %s635_s26 = smov [#allocation5]  }
  0x40   : > { %p532_p2 = scmp.ne.s32.totalorder %s165_s19, %s531_s25  ;;  %s536_s3 = sshll.u32 %s635_s26, 4  ;;  %s537_s3 = int_to_ptr.vmem [resolvable:$false] %s536_s3 }
  0x41   : > { %s538_s8 = scalar_lea.vmem %s537_s3, 256  ;;  %p539_p8 = scmp.lt.s32.totalorder %s165_s19, %s537_s3 }
  0x42   : > { %p534_p9 = pnand %p532_p2, %p488_p5  ;;  %p540_p7 = scmp.lt.s32.totalorder %s538_s8, %s531_s25 }
  0x44   : > { %p535_p11 = pneg %p534_p9  ;;  %p541_p3 = por %p540_p7, %p539_p8 }
  0x46   : > { %p542_p6 = pnand %p541_p3, %p535_p11 }
  0x48   : > { %545 = shalt.err (!%p542_p6)
}
  0x49   : > { %422 = dma.hbm_to_vmem [thread:$0]  (!%p736_p0), %s781_s16, 128, %s165_s19, %s153_s30  }
  0x4a   : > { %p897_p13 = scmp.ne.s32.totalorder %s896_s7, 0 }
  0x4b   : > { %s808_s15 = sand.u32 (!%p897_p13), 1, %s616_s10   ;;  %p898_p5 = scmp.ne.s32.totalorder (!%p897_p13), %s890_s21, 0 }
  0x4c   : > { %173 = sbr.rel (%p897_p13) target bundleno = 137 (0x89), region = 28  ;;  %s395_s18 = sshll.u32 (!%p897_p13), %s808_s15, 3 }
  0x4d   : > { %s176_s4 = scalar_lea.sflag (!%p897_p13), [#allocation3], %s808_s15  ;;  %s179_s6 = scalar_lea.vmem (!%p897_p13), [#allocation2], %s395_s18 }
  0x53   : > { %599 = dma.done.wait (%p898_p5), %s176_s4, 128  }
  0x54   : > { %601 = vsyncadd (%p898_p5), %s176_s4, 4294967168  ;;  %s185_s5 = scalar_lea.sflag [#allocation6], %s808_s15  ;;  %s188_s16 = scalar_lea.vmem [#allocation5], %s395_s18 }
  0x55   : > { %603 = dma.done.wait (%p898_p5), %s185_s5, 128  }
  0x56   : > { %605 = vsyncadd (%p898_p5), %s185_s5, 4294967168  ;;  %s397_s7 = sshll.u32 %s808_s15, 5  ;;  %v222_v0 = vld [vmem:[%s179_s6] sm:$0xff]  ;;  %v223_v1 = vld [vmem:[%s188_s16] sm:$0xff]  ;;  %s409_s21 = sshll.u32 %s624_s12, 9 }
  0x57   : > { %v224_v2 = vand.u32 2147483647, %v222_v0  ;;  %s822_s19 = scalar_lea.vmem [#allocation7], %s397_s7  ;;  %v228_v9 = vmax.f32 %v222_v0, 0.0  ;;  %v229_v10 = vmul.f32 %v223_v1, %v222_v0  ;;  %vm241_vm0 = vcmp.ge.f32.partialorder %v222_v0, 0.0  ;;  %s830_s28 = scalar_lea.hbm %s886_s2, %s409_s21 }
  0x58   : > { %403 = vst [vmem:[%s822_s19 + $0x18] sm:$0xff] %v223_v1  ;;  %s280_s30 = sshll.u32 %s822_s19, 4  ;;  %s267_s29 = scalar_lea.sflag [#allocation4], %s808_s15  ;;  %s832_s30 = int_to_ptr.vmem [resolvable:$true] %s280_s30 }
  0x59   : > { %v225_v3 = vsub.f32 0.0, %v224_v2  ;;  %v230_v15 = vsub.f32 %v228_v9, %v229_v10  ;;  %s546_s25 = scalar_lea.vmem %s832_s30, 512  ;;  %p899_p0 = scmp.ne.s32.totalorder %s891_s22, 0 }
  0x5a   : > { %p547_p8 = scmp.ne.s32.totalorder %s832_s30, %s546_s25  ;;  %s636_s12 = smov [#allocation7]  }
  0x5b   : > { %v226_v4 = vmul.f32 1.442695, %v225_v3  ;;  %s550_s26 = sshll.u32 %s636_s12, 4  ;;  %s551_s26 = int_to_ptr.vmem [resolvable:$false] %s550_s26 }
  0x5c   : > { %p548_p7 = pnand %p547_p8, %p899_p0  ;;  %s552_s3 = scalar_lea.vmem %s551_s26, 1024 }
  0x5d   : > { %480 = vpow2.f32 %v226_v4  ;;  %p553_p10 = scmp.lt.s32.totalorder %s832_s30, %s551_s26  ;;  %p554_p12 = scmp.lt.s32.totalorder %s552_s3, %s546_s25 }
  0x5e   : > { %p549_p4 = pneg %p548_p7 }
  0x5f   : > { %p555_p1 = por %p554_p12, %p553_p10 }
  0x61   : > { %p556_p2 = pnand %p555_p1, %p549_p4 }
  0x67   : > { %v481_v5 = vpop.eup %480 }
  0x68   : > { %v231_v6 = vadd.f32 1.0, %v481_v5  ;;  %v234_v7 = vmul.f32 -0.5, %v481_v5  ;;  %v237_v11 = vand.u32 2147483647, %v481_v5  ;;  %v242_v13 = vsel %vm241_vm0, 1.0, %v481_v5 }
  0x6a   : > { %482 = vlog2.f32 %v231_v6  ;;  %v235_v8 = vadd.f32 1.0, %v234_v7  ;;  %vm238_vm1 = vcmp.lt.f32.partialorder %v237_v11, 0.0004427343 }
  0x6b   : > { %484 = vrcp.f32 %v231_v6 }
  0x6c   : > { %v236_v12 = vmul.f32 %v481_v5, %v235_v8 }
  0x74   : > { %v483_v14 = vpop.eup %482 }
  0x75   : > { %v485_v16 = vpop.eup %484  ;;  %v233_v17 = vmul.f32 0.6931472, %v483_v14 }
  0x76   : > { %v245_v18 = vmul.f32 %v485_v16, %v242_v13 }
  0x77   : > { %v239_v19 = vsel %vm238_vm1, %v236_v12, %v233_v17 }
  0x78   : > { %v240_v20 = vadd.f32 %v239_v19, %v230_v15  ;;  %v252_v21 = vmul.f32 %v245_v18, %v223_v1  ;;  %401 = vst [vmem:[%s822_s19 + $0x10] sm:$0xff] %v245_v18 }
  0x7a   : > { %249 = vst [vmem:[%s822_s19] sm:$0xff] %v240_v20  ;;  %399 = vst [vmem:[%s822_s19 + $0x8] sm:$0xff] %v252_v21 }
  0x7b   : > { %559 = shalt.err (!%p556_p2)
}
  0x7c   : > { %s560_s8 = scalar_lea.hbm %s830_s28, 512  ;;  %s564_s6 = scalar_lea.hbm %s886_s2, 1024 }
  0x7d   : > { %p561_p9 = scmp.ne.s32.totalorder %s830_s28, %s560_s8  ;;  %p565_p6 = scmp.lt.u32.totalorder %s830_s28, %s886_s2 }
  0x7e   : > { %p566_p13 = scmp.lt.u32.totalorder %s564_s6, %s560_s8  ;;  %p568_p8 = scmp.lt.u32.totalorder %s560_s8, %s830_s28 }
  0x7f   : > { %p562_p11 = pnand %p561_p9, %p899_p0 }
  0x80   : > { %p567_p5 = por %p566_p13, %p565_p6 }
  0x81   : > { %p563_p3 = pneg %p562_p11 }
  0x82   : > { %p569_p7 = por %p568_p8, %p567_p5 }
  0x84   : > { %p570_p4 = pnand %p569_p7, %p563_p3 }
  0x86   : > { %573 = shalt.err (!%p570_p4)
}
  0x87   : > { %s637_s7 = smov 128   ;;  %s638_s19 = smov 8  }
  0x88   : > { %414 = dma.vmem_to_hbm [thread:$0]  (%p899_p0), %s832_s30, 512, %s830_s28, %s267_s29, %s637_s7, %s637_s7, %s638_s19  }
  0x89 PF: > { %s295_s21 = sand.u32 1, %s612_s9   ;;  %p900_p10 = scmp.ne.s32.totalorder %s892_s24, 0 }
  0x8a   : > { %p901_p12 = scmp.ge.s32.totalorder %s632_s14, 2  ;;  %s296_s20 = scalar_lea.sflag [#allocation4], %s295_s21 }
  0x8c   : > { %p424_p1 = pnand %p901_p12, %p900_p10 }
  0x8e   : > { %607 = dma.done.wait (!%p424_p1), %s296_s20, 512  }
  0x8f   : > { %609 = vsyncadd (!%p424_p1), %s296_s20, 4294966784  ;;  %s21_s14 = sadd.s32 1, %s632_s14   ;;  %s902_s9 = smov %s616_s10 }
  0x90   : > { %p18_p2 = scmp.ge.s32.totalorder %s21_s14, 4   ;;  %s903_s10 = smov %s620_s11 }
  0x91   : > { %s904_s11 = smov %s710_s23  ;;  %s905_s12 = smov %s628_s13 }
  0x92   : > { %s906_s13 = smov %s908_s17  ;;  %20 = sbr.rel (!%p18_p2) target bundleno = 8 (0x8), region = 93 }
  0x99   :  { %301 = vsyncpa [#allocation3], 1 }
  0x9a   :  { %303 = vsyncpa [#allocation3 + $0x1], 1 }
  0x9b   :  { %304 = vsyncpa [#allocation6], 1 }
  0x9c   :  { %306 = vsyncpa [#allocation6 + $0x1], 1 }
  0x9d   :  { %307 = vsyncpa [#allocation4], 1 }
  0x9e   :  { %309 = vsyncpa [#allocation4 + $0x1], 1 }

</bundles_post_ra>
